<compile_context>
chip_gen: v5e
topology: v5e:2x2
jax: 0.10.0
libtpu: 0.0.40
codegen_flags: <defaults>
</compile_context>

<pallas_src>
import math

import jax
import jax.numpy as jnp
from jax import lax
from jax.experimental import pallas as pl
from jax.experimental.pallas import tpu as pltpu

# ---- small problem sizes consistent with the module ----
BATCH, SEQ, DIM, CLASS_NUM = 2, 8, 32, 128


# ----------------------------- kernel -----------------------------
def _classifier_kernel(x_ref, w_ref, o_ref):
    # x_ref: (rows, dim), w_ref: (class_num, dim)  [native nn.Linear layout]
    # o_ref: (rows, class_num)
    # Contract over dim (axis 1 of both) => x @ W^T in one MXU dot; f32 accumulate.
    o_ref[...] = lax.dot_general(
        x_ref[...],
        w_ref[...],
        dimension_numbers=(((1,), (1,)), ((), ())),
        preferred_element_type=jnp.float32,
    ).astype(o_ref.dtype)


# ----------------------------- wrapper -----------------------------
def classifier_pallas(x, weight):
    """x: (..., dim); weight: (class_num, dim) in PyTorch nn.Linear layout (no bias)."""
    *lead, dim = x.shape
    class_num = weight.shape[0]
    rows = math.prod(lead) if lead else 1

    x2 = x.reshape(rows, dim)  # fold batch/seq into MXU rows

    itemsize = jnp.dtype(x.dtype).itemsize
    cost = pl.CostEstimate(
        flops=2 * rows * dim * class_num,
        transcendentals=0,
        bytes_accessed=itemsize * (rows * dim + dim * class_num + rows * class_num),
    )

    out = pl.pallas_call(
        _classifier_kernel,
        out_shape=jax.ShapeDtypeStruct((rows, class_num), x.dtype),
        in_specs=[
            pl.BlockSpec(memory_space=pltpu.MemorySpace.VMEM),
            pl.BlockSpec(memory_space=pltpu.MemorySpace.VMEM),
        ],
        out_specs=pl.BlockSpec(memory_space=pltpu.MemorySpace.VMEM),
        cost_estimate=cost,
    )(x2, weight)

    return out.reshape(*lead, class_num)


# ----------------------------- demo / self-test -----------------------------
if __name__ == "__main__":
    root = jax.random.PRNGKey(0)
    kx, kw = jax.random.split(root)

    x = jax.random.normal(kx, (BATCH, SEQ, DIM), jnp.float32)
    # weights_init_classifier: nn.init.normal_(weight, std=0.001); bias=False
    weight = 0.001 * jax.random.normal(kw, (CLASS_NUM, DIM), jnp.float32)

    out = classifier_pallas(x, weight)
    out = jax.block_until_ready(out)

    assert out.shape == (BATCH, SEQ, CLASS_NUM)
    assert bool(jnp.all(jnp.isfinite(out)))

    # correctness check against plain XLA reference (x @ W^T)
    ref = jnp.einsum("bsd,cd->bsc", x, weight)
    assert bool(jnp.allclose(out, ref, atol=1e-5, rtol=1e-5))

    print("KERNEL_OK")
</pallas_src>

<mosaic_0001>
module attributes {stable_mosaic.version = 11 : i64} {
  func.func @_classifier_kernel(%arg0: memref<16x32xf32, #tpu.memory_space<vmem>>, %arg1: memref<128x32xf32, #tpu.memory_space<vmem>>, %arg2: memref<16x128xf32, #tpu.memory_space<vmem>>) attributes {dimension_semantics = [], scalar_prefetch = 0 : i64, scratch_operands = 0 : i64, tpu.core_type = #tpu.core_type<tc>} {
    %c0 = arith.constant 0 : index
    %c0_0 = arith.constant 0 : index
    %0 = vector.load %arg0[%c0, %c0_0] : memref<16x32xf32, #tpu.memory_space<vmem>>, vector<16x32xf32>
    %c0_1 = arith.constant 0 : index
    %c0_2 = arith.constant 0 : index
    %1 = vector.load %arg1[%c0_1, %c0_2] : memref<128x32xf32, #tpu.memory_space<vmem>>, vector<128x32xf32>
    %cst = arith.constant dense<0.000000e+00> : vector<16x128xf32>
    %2 = tpu.matmul %0, %1, %cst {dimension_numbers = #tpu.dot_dimension_numbers<[1], [1], [0], [0], [0, 0, 1, 0], [], []>} : vector<16x32xf32>, vector<128x32xf32>, vector<16x128xf32> -> vector<16x128xf32>
    %c0_3 = arith.constant 0 : index
    %c0_4 = arith.constant 0 : index
    %3 = vector.load %arg2[%c0_3, %c0_4] : memref<16x128xf32, #tpu.memory_space<vmem>>, vector<16x128xf32>
    tpu.vector_store %arg2[%c0_3, %c0_4], %2 {strides = array<i32>} : memref<16x128xf32, #tpu.memory_space<vmem>>, vector<16x128xf32>,
    return
  }
}

</mosaic_0001>

<bundles_post_ra>
// kernel: tpu_custom_call.1
= control target key start
LH: loop header
LB: loop body
LE: loop exit
PB: predicated region body
PF: predicated region fallthrough
CT: control target
= control target key end

     0   :  { %vm30_vm0 = vcmask 261120   ;;  %s300_s0 = inlined_call_operand.vmem [shape: f32[16,32], index: 0, kind: input, shape index: {}]   ;;  %s301_s1 = inlined_call_operand.vmem [shape: f32[128,32], index: 1, kind: input, shape index: {}]   ;;  %s302_s2 = inlined_call_operand.hbm [shape: f32[16,128], index: 2, kind: output, shape index: {}]  }
   0x1   :  { %v29_v0 = vld [vmem:[%s301_s1 + $0x78] sm:$0xff]  ;;  %v28_v1 = vld [vmem:[%s301_s1 + $0x70] sm:$0xff] }
   0x2   :  { %128 = vmatpush.xpose.msk.msra.mxu0 %vm30_vm0, %v29_v0  ;;  %146 = vmatpush.xpose.msk.msra.mxu1 %vm30_vm0, %v29_v0 }
   0x3   :  { %7 = vsyncpa [#allocation3], 0  ;;  %v27_v2 = vld [vmem:[%s301_s1 + $0x68] sm:$0xff]  ;;  %v26_v3 = vld [vmem:[%s301_s1 + $0x60] sm:$0xff]  ;;  %s191_s17 = smov [#allocation2]   ;;  %s116_s20 = sshll.u32 %s302_s2, 4  ;;  %s117_s20 = int_to_ptr.hbm [resolvable:$true] %s116_s20 }
   0x4   :  { %v25_v4 = vld [vmem:[%s301_s1 + $0x58] sm:$0xff]  ;;  %v24_v5 = vld [vmem:[%s301_s1 + $0x50] sm:$0xff]  ;;  %v23_v6 = vld [vmem:[%s301_s1 + $0x48] sm:$0xff]  ;;  %s114_s18 = sshll.u32 %s191_s17, 4  ;;  %s192_s21 = smov 128   ;;  %s115_s18 = int_to_ptr.vmem [resolvable:$true] %s114_s18 }
   0x5   :  { %v22_v7 = vld [vmem:[%s301_s1 + $0x40] sm:$0xff]  ;;  %v21_v8 = vld [vmem:[%s301_s1 + $0x38] sm:$0xff]  ;;  %v20_v9 = vld [vmem:[%s301_s1 + $0x30] sm:$0xff]  ;;  %s193_s22 = smov 8  }
   0x6   :  { %129 = vmatpush.xpose.msk.msra.mxu0 %vm30_vm0, %v28_v1  ;;  %147 = vmatpush.xpose.msk.msra.mxu1 %vm30_vm0, %v28_v1  ;;  %v19_v10 = vld [vmem:[%s301_s1 + $0x28] sm:$0xff]  ;;  %v18_v11 = vld [vmem:[%s301_s1 + $0x20] sm:$0xff]  ;;  %v17_v12 = vld [vmem:[%s301_s1 + $0x18] sm:$0xff] }
   0x7   :  { %v16_v13 = vld [vmem:[%s301_s1 + $0x10] sm:$0xff]  ;;  %v15_v14 = vld [vmem:[%s301_s1 + $0x8] sm:$0xff]  ;;  %v14_v15 = vld [vmem:[%s301_s1] sm:$0xff] }
   0x8   :  { %v12_v16 = vld [vmem:[%s300_s0] sm:$0xff]  ;;  %v13_v17 = vld [vmem:[%s300_s0 + $0x8] sm:$0xff] }
   0xa   :  { %130 = vmatpush.xpose.msk.msra.mxu0 %vm30_vm0, %v27_v2  ;;  %148 = vmatpush.xpose.msk.msra.mxu1 %vm30_vm0, %v27_v2 }
   0xe   :  { %131 = vmatpush.xpose.msk.msra.mxu0 %vm30_vm0, %v26_v3  ;;  %149 = vmatpush.xpose.msk.msra.mxu1 %vm30_vm0, %v26_v3 }
  0x12   :  { %132 = vmatpush.xpose.msk.msra.mxu0 %vm30_vm0, %v25_v4  ;;  %150 = vmatpush.xpose.msk.msra.mxu1 %vm30_vm0, %v25_v4 }
  0x16   :  { %133 = vmatpush.xpose.msk.msra.mxu0 %vm30_vm0, %v24_v5  ;;  %151 = vmatpush.xpose.msk.msra.mxu1 %vm30_vm0, %v24_v5 }
  0x1a   :  { %134 = vmatpush.xpose.msk.msra.mxu0 %vm30_vm0, %v23_v6  ;;  %152 = vmatpush.xpose.msk.msra.mxu1 %vm30_vm0, %v23_v6 }
  0x1e   :  { %135 = vmatpush.xpose.msk.msra.mxu0 %vm30_vm0, %v22_v7  ;;  %153 = vmatpush.xpose.msk.msra.mxu1 %vm30_vm0, %v22_v7 }
  0x22   :  { %136 = vmatpush.xpose.msk.msra.mxu0 %vm30_vm0, %v21_v8  ;;  %154 = vmatpush.xpose.msk.msra.mxu1 %vm30_vm0, %v21_v8 }
  0x26   :  { %137 = vmatpush.xpose.msk.msra.mxu0 %vm30_vm0, %v20_v9  ;;  %155 = vmatpush.xpose.msk.msra.mxu1 %vm30_vm0, %v20_v9 }
  0x2a   :  { %138 = vmatpush.xpose.msk.msra.mxu0 %vm30_vm0, %v19_v10  ;;  %156 = vmatpush.xpose.msk.msra.mxu1 %vm30_vm0, %v19_v10 }
  0x2e   :  { %139 = vmatpush.xpose.msk.msra.mxu0 %vm30_vm0, %v18_v11  ;;  %157 = vmatpush.xpose.msk.msra.mxu1 %vm30_vm0, %v18_v11 }
  0x32   :  { %140 = vmatpush.xpose.msk.msra.mxu0 %vm30_vm0, %v17_v12  ;;  %158 = vmatpush.xpose.msk.msra.mxu1 %vm30_vm0, %v17_v12 }
  0x36   :  { %141 = vmatpush.xpose.msk.msra.mxu0 %vm30_vm0, %v16_v13  ;;  %159 = vmatpush.xpose.msk.msra.mxu1 %vm30_vm0, %v16_v13 }
  0x3a   :  { %142 = vmatpush.xpose.msk.msra.mxu0 %vm30_vm0, %v15_v14  ;;  %160 = vmatpush.xpose.msk.msra.mxu1 %vm30_vm0, %v15_v14 }
  0x3e   :  { %143 = vmatpush.xpose.msk.msra.mxu0 %vm30_vm0, %v14_v15  ;;  %161 = vmatpush.xpose.msk.msra.mxu1 %vm30_vm0, %v14_v15 }
  0x41   :  { %144 = vmatmul.msk.f32.vlgmr.msra.gmra.mxu0 %vm30_vm0, %v12_v16  ;;  %145 = vmatmul.msk.f32.vlgmr.msra.gmra.mxu1 %vm30_vm0, %v13_v17 }
  0xbe   :  { %v102_v18 = vpop.f32.mrf.mxu0  ;;  %v105_v19 = vpop.f32.mrf.mxu1 }
  0xbf   :  { %108 = vst [vmem:[#allocation2] sm:$0xff] %v102_v18 }
  0xc0   :  { %109 = vst [vmem:[#allocation2 + $0x8] sm:$0xff] %v105_v19 }
  0xc1   :  { %122 = dma.vmem_to_hbm [thread:$0]  %s115_s18, 256, %s117_s20, [#allocation3], %s192_s21, %s192_s21, %s193_s22  }
  0xc2   :  { %189 = dma.done.wait [#allocation3], 256  }
  0xc3   :  { %190 = vsyncadd [#allocation3], 4294967040 }
  0xc4   :  { %127 = vsyncpa [#allocation3], 1 }

</bundles_post_ra>
